<compile_context>
chip_gen: v7x
topology: tpu7x:2x2x1
jax: 0.10.0
libtpu: 0.0.40
codegen_flags: <defaults>
</compile_context>

<pallas_src>
import functools

import jax
import jax.numpy as jnp
import numpy as np
from jax.experimental import pallas as pl
from jax.experimental.pallas import tpu as pltpu


# ----------------------------- Pallas kernels ------------------------------ #

def _bilstm_chunk_kernel(len_ref, gxf_ref, gxb_ref, whhf_ref, whhb_ref,
                         outf_ref, outb_ref, hff_ref, hfb_ref,
                         hf_scr, cf_scr, hb_scr, cb_scr, *, tt, hd):
    """One time-chunk of a fused bidirectional LSTM layer.

    Grid axis 0 = time chunks (sequential).  The forward direction consumes chunk i,
    the backward direction consumes chunk (n_chunks - 1 - i); both advance their own
    (h, c) carries kept in VMEM scratch.  The input projection (x @ W_ih^T + b) is
    precomputed, so each timestep is a single (B, H) @ (H, 4H) MXU push per direction.
    """
    i = pl.program_id(0)
    nc = pl.num_programs(0)

    @pl.when(i == 0)
    def _():
        hf_scr[...] = jnp.zeros_like(hf_scr)
        cf_scr[...] = jnp.zeros_like(cf_scr)
        hb_scr[...] = jnp.zeros_like(hb_scr)
        cb_scr[...] = jnp.zeros_like(cb_scr)

    lengths = len_ref[...]          # (B, 1) int32 -- hoisted out of the inner loop
    whh_f = whhf_ref[...]           # (H, 4H) bf16 -- resident weights, hoisted
    whh_b = whhb_ref[...]
    t0_f = i * tt                   # first absolute timestep of the fwd chunk
    t0_b = (nc - 1 - i) * tt        # first absolute timestep of the bwd chunk

    def cell(gx, h_prev, c_prev, whh, mask):
        # gx already holds x @ W_ih^T + (b_ih + b_hh); only the recurrent matmul remains.
        gates = gx + jnp.dot(h_prev.astype(jnp.bfloat16), whh,
                             preferred_element_type=jnp.float32)      # (B, 4H) f32
        ig = jax.nn.sigmoid(gates[:, 0 * hd:1 * hd])   # PyTorch gate order i, f, g, o
        fg = jax.nn.sigmoid(gates[:, 1 * hd:2 * hd])
        gg = jnp.tanh(gates[:, 2 * hd:3 * hd])
        og = jax.nn.sigmoid(gates[:, 3 * hd:4 * hd])
        c_new = fg * c_prev + ig * gg
        h_new = og * jnp.tanh(c_new)
        # packed-sequence semantics: freeze (h, c) once t >= length_b
        return jnp.where(mask, h_new, h_prev), jnp.where(mask, c_new, c_prev)

    def body(tl, carry):
        # forward direction: absolute time t0_f + tl (ascending)
        hf, cf = cell(gxf_ref[tl], hf_scr[...], cf_scr[...], whh_f,
                      (t0_f + tl) < lengths)
        hf_scr[...] = hf
        cf_scr[...] = cf
        outf_ref[tl] = hf.astype(outf_ref.dtype)
        # backward direction: absolute time t0_b + (tt - 1 - tl) (descending)
        tlb = tt - 1 - tl
        hb, cb = cell(gxb_ref[tlb], hb_scr[...], cb_scr[...], whh_b,
                      (t0_b + tlb) < lengths)
        hb_scr[...] = hb
        cb_scr[...] = cb
        outb_ref[tlb] = hb.astype(outb_ref.dtype)
        return carry

    jax.lax.fori_loop(0, tt, body, 0, unroll=True)

    @pl.when(i == nc - 1)
    def _():
        hff_ref[...] = hf_scr[...]      # final fwd hidden == PyTorch hidden[-2]
        hfb_ref[...] = hb_scr[...]      # final bwd hidden == PyTorch hidden[-1]


def input_proj_pallas(xs, ws, b):
    """gates_x[M, N] = sum_k xs[k] @ ws[k] + b   (bf16 MXU inputs, f32 accumulate).

    One dense GEMM for all timesteps and both directions; splitting K over `xs`
    lets layer l>0 consume (out_fwd, out_bwd) without materializing a concat.
    """
    n = len(xs)
    M, N = xs[0].shape[0], ws[0].shape[1]
    tm = M if (M <= 1024 or M % 512 != 0) else 512   # toy sizes -> single M block
    grid = (M // tm,)

    def kernel(*refs):
        x_refs, w_refs = refs[:n], refs[n:2 * n]
        b_ref, o_ref = refs[2 * n], refs[2 * n + 1]
        acc = jnp.dot(x_refs[0][...], w_refs[0][...],
                      preferred_element_type=jnp.float32)
        for k in range(1, n):
            acc = acc + jnp.dot(x_refs[k][...], w_refs[k][...],
                                preferred_element_type=jnp.float32)
        o_ref[...] = acc + b_ref[...]

    in_specs = ([pl.BlockSpec((tm, x.shape[1]), lambda i: (i, 0)) for x in xs]
                + [pl.BlockSpec(w.shape, lambda i: (0, 0)) for w in ws]
                + [pl.BlockSpec(b.shape, lambda i: (0, 0))])
    return pl.pallas_call(
        kernel,
        out_shape=jax.ShapeDtypeStruct((M, N), jnp.float32),
        grid=grid,
        in_specs=in_specs,
        out_specs=pl.BlockSpec((tm, N), lambda i: (i, 0)),
        compiler_params=pltpu.CompilerParams(
            dimension_semantics=("parallel",),
            vmem_limit_bytes=32 * 1024 * 1024),
    )(*xs, *ws, b)


# ------------------------------- wrappers ---------------------------------- #

def bilstm_layer_pallas(x_parts, len_col, lp, *, tt):
    """One bidirectional LSTM layer: returns (out_fwd, out_bwd, hfin_fwd, hfin_bwd)."""
    T_pad, B_pad = x_parts[0].shape[:2]
    H = lp["whh_f_t"].shape[0]
    nC = T_pad // tt
    M = T_pad * B_pad

    # 1) hoisted input projection, both directions in one GEMM -> (T, B, 8H) f32
    xs2d = [xp.reshape(M, xp.shape[-1]) for xp in x_parts]
    gx = input_proj_pallas(xs2d, lp["wih_parts"], lp["b_cat"])
    gx = gx.reshape(T_pad, B_pad, 8 * H)

    # 2) fused bidirectional recurrence over time chunks
    kernel = functools.partial(_bilstm_chunk_kernel, tt=tt, hd=H)
    of, ob, hf, hb = pl.pallas_call(
        kernel,
        out_shape=(jax.ShapeDtypeStruct((T_pad, B_pad, H), jnp.bfloat16),
                   jax.ShapeDtypeStruct((T_pad, B_pad, H), jnp.bfloat16),
                   jax.ShapeDtypeStruct((B_pad, H), jnp.float32),
                   jax.ShapeDtypeStruct((B_pad, H), jnp.float32)),
        grid=(nC,),
        in_specs=[
            pl.BlockSpec((B_pad, 1), lambda i: (0, 0)),                      # lengths
            pl.BlockSpec((tt, B_pad, 4 * H), lambda i: (i, 0, 0)),           # fwd gates_x
            pl.BlockSpec((tt, B_pad, 4 * H), lambda i: (nC - 1 - i, 0, 1)),  # bwd gates_x
            pl.BlockSpec((H, 4 * H), lambda i: (0, 0)),                      # W_hh fwd
            pl.BlockSpec((H, 4 * H), lambda i: (0, 0)),                      # W_hh bwd
        ],
        out_specs=(
            pl.BlockSpec((tt, B_pad, H), lambda i: (i, 0, 0)),               # fwd outputs
            pl.BlockSpec((tt, B_pad, H), lambda i: (nC - 1 - i, 0, 0)),      # bwd outputs
            pl.BlockSpec((B_pad, H), lambda i: (0, 0)),                      # final h fwd
            pl.BlockSpec((B_pad, H), lambda i: (0, 0)),                      # final h bwd
        ),
        scratch_shapes=[pltpu.VMEM((B_pad, H), jnp.float32)] * 4,            # h/c x 2 dirs
        compiler_params=pltpu.CompilerParams(
            dimension_semantics=("arbitrary",),        # time recurrence is sequential
            vmem_limit_bytes=32 * 1024 * 1024),
    )(len_col, gx, gx, lp["whh_f_t"], lp["whh_b_t"])
    return of, ob, hf, hb


# ------------------------- pure-JAX reference ------------------------------ #

def bilstm_layer_ref(x_parts, len_col, lp, *, tt):
    """Pure-JAX reference with identical math/dtypes (bf16 MXU inputs, f32 state)."""
    del tt
    T_pad, B_pad = x_parts[0].shape[:2]
    H = lp["whh_f_t"].shape[0]
    M = T_pad * B_pad

    acc = None
    for xp, wp in zip(x_parts, lp["wih_parts"]):
        d = jnp.dot(xp.reshape(M, -1).astype(jnp.bfloat16), wp,
                    preferred_element_type=jnp.float32)
        acc = d if acc is None else acc + d
    gx = (acc + lp["b_cat"]).reshape(T_pad, B_pad, 8 * H)

    def make_step(whh):
        def step(carry, inp):
            h, c = carry
            g_x, t = inp
            gates = g_x + jnp.dot(h.astype(jnp.bfloat16), whh,
                                  preferred_element_type=jnp.float32)
            ig = jax.nn.sigmoid(gates[:, :H])
            fg = jax.nn.sigmoid(gates[:, H:2 * H])
            gg = jnp.tanh(gates[:, 2 * H:3 * H])
            og = jax.nn.sigmoid(gates[:, 3 * H:])
            c_new = fg * c + ig * gg
            h_new = og * jnp.tanh(c_new)
            mask = t < len_col
            h2 = jnp.where(mask, h_new, h)
            c2 = jnp.where(mask, c_new, c)
            return (h2, c2), h2
        return step

    init = (jnp.zeros((B_pad, H), jnp.float32), jnp.zeros((B_pad, H), jnp.float32))
    ts = jnp.arange(T_pad)
    (hf, _), of = jax.lax.scan(make_step(lp["whh_f_t"]), init, (gx[..., :4 * H], ts))
    (hb, _), ob_rev = jax.lax.scan(make_step(lp["whh_b_t"]), init,
                                   (gx[::-1, :, 4 * H:], ts[::-1]))
    ob = ob_rev[::-1]
    return of.astype(jnp.bfloat16), ob.astype(jnp.bfloat16), hf, hb


# ------------------------------ full model --------------------------------- #

def bilstm_forward(params, text, text_lengths, *, use_pallas=True, tt=4):
    T, B = text.shape
    T_pad = -(-T // tt) * tt                      # time padded to chunk multiple
    B_pad = -(-B // 8) * 8                        # batch padded to the sublane tile
    text_p = jnp.full((T_pad, B_pad), params["pad_idx"], jnp.int32).at[:T, :B].set(text)
    len_col = jnp.zeros((B_pad, 1), jnp.int32).at[:B, 0].set(text_lengths.astype(jnp.int32))

    # TODO(synk): embedding row-gather kept in plain JAX (data-dependent gather);
    # dropout is identity (eval mode).
    emb = params["embedding"][text_p]             # (T_pad, B_pad, E) f32
    x_parts = [emb.astype(jnp.bfloat16)]

    layer_fn = bilstm_layer_pallas if use_pallas else bilstm_layer_ref
    hf = hb = None
    for lp in params["lstm"]:
        of, ob, hf, hb = layer_fn(x_parts, len_col, lp, tt=tt)
        x_parts = [of, ob]                        # no concat: next layer K-splits its GEMM

    hidden = jnp.concatenate([hf[:B], hb[:B]], axis=1)   # (B, 2H) == cat(h[-2], h[-1])
    # Tiny classifier left to XLA per perf review (a dedicated pallas_call costs more).
    return hidden @ params["fc_w_t"] + params["fc_b"]


# ------------------------------- main / init -------------------------------- #

def init_params(key, vocab_size, embedding_dim, hidden_dim, output_dim,
                n_layers, pad_idx):
    params = {"pad_idx": pad_idx, "hidden_dim": hidden_dim}
    key, k_emb = jax.random.split(key)
    emb = 0.1 * jax.random.normal(k_emb, (vocab_size, embedding_dim), jnp.float32)
    params["embedding"] = emb.at[pad_idx].set(0.0)       # padding_idx row is zero

    scale = 1.0 / np.sqrt(hidden_dim)
    layers = []
    for l in range(n_layers):
        d_in = embedding_dim if l == 0 else 2 * hidden_dim
        wih, whh, bb = {}, {}, {}
        for dname in ("f", "b"):
            key, k1, k2, k3, k4 = jax.random.split(key, 5)
            wih[dname] = jax.random.uniform(k1, (d_in, 4 * hidden_dim), jnp.float32, -scale, scale)
            whh[dname] = jax.random.uniform(k2, (hidden_dim, 4 * hidden_dim), jnp.float32, -scale, scale)
            b_ih = jax.random.uniform(k3, (4 * hidden_dim,), jnp.float32, -scale, scale)
            b_hh = jax.random.uniform(k4, (4 * hidden_dim,), jnp.float32, -scale, scale)
            bb[dname] = b_ih + b_hh                      # combined bias (same math as PyTorch)
        wih_cat = jnp.concatenate([wih["f"], wih["b"]], axis=1).astype(jnp.bfloat16)  # (d_in, 8H)
        if l == 0:
            wih_parts = [wih_cat]
        else:                                            # layer input is [out_fwd, out_bwd]
            wih_parts = [wih_cat[:hidden_dim], wih_cat[hidden_dim:]]
        layers.append({
            "wih_parts": wih_parts,
            "b_cat": jnp.concatenate([bb["f"], bb["b"]]).reshape(1, 8 * hidden_dim),
            "whh_f_t": whh["f"].astype(jnp.bfloat16),
            "whh_b_t": whh["b"].astype(jnp.bfloat16),
        })
    params["lstm"] = layers

    key, k_w, k_b = jax.random.split(key, 3)
    fscale = 1.0 / np.sqrt(2 * hidden_dim)
    params["fc_w_t"] = jax.random.uniform(k_w, (2 * hidden_dim, output_dim), jnp.float32, -fscale, fscale)
    params["fc_b"] = jax.random.uniform(k_b, (1, output_dim), jnp.float32, -fscale, fscale)
    return params


if __name__ == "__main__":
    vocab_size, embedding_dim, hidden_dim, output_dim = 64, 32, 32, 4
    n_layers, pad_idx = 2, 1
    T, B = 8, 4

    key = jax.random.PRNGKey(0)
    key, k_params, k_text = jax.random.split(key, 3)
    params = init_params(k_params, vocab_size, embedding_dim, hidden_dim,
                         output_dim, n_layers, pad_idx)

    # pack_padded_sequence requires lengths sorted descending.
    text_lengths = jnp.array([8, 7, 5, 3], dtype=jnp.int32)       # (B,)
    text = jax.random.randint(k_text, (T, B), 2, vocab_size, dtype=jnp.int32)
    pos = jnp.arange(T)[:, None]
    text = jnp.where(pos < text_lengths[None, :], text, pad_idx)  # pad tail with pad_idx

    logits = bilstm_forward(params, text, text_lengths, use_pallas=True)
    logits = jax.block_until_ready(logits)

    logits_ref = bilstm_forward(params, text, text_lengths, use_pallas=False)
    logits_ref = jax.block_until_ready(logits_ref)

    np.testing.assert_allclose(np.asarray(logits), np.asarray(logits_ref),
                               rtol=2e-3, atol=2e-3)
    print("KERNEL_OK")
</pallas_src>

<mosaic_0001>
module attributes {stable_mosaic.version = 11 : i64} {
  func.func @kernel(%arg0: i32, %arg1: memref<64x32xbf16, #tpu.memory_space<vmem>>, %arg2: memref<32x256xbf16, #tpu.memory_space<vmem>>, %arg3: memref<1x256xf32, #tpu.memory_space<vmem>>, %arg4: memref<64x256xf32, #tpu.memory_space<vmem>>) attributes {dimension_semantics = [#tpu.dimension_semantics<parallel>], iteration_bounds = array<i64: 1>, scalar_prefetch = 0 : i64, scratch_operands = 0 : i64, tpu.core_type = #tpu.core_type<tc>, window_params = [{transform_indices = @transform_0, window_bounds = array<i64: 64, 32>}, {pipeline_mode = #tpu.pipeline_mode<synchronous>, transform_indices = @transform_1, window_bounds = array<i64: 32, 256>}, {pipeline_mode = #tpu.pipeline_mode<synchronous>, transform_indices = @transform_2, window_bounds = array<i64: 1, 256>}, {transform_indices = @transform_3, window_bounds = array<i64: 64, 256>}]} {
    %c0 = arith.constant 0 : index
    %c0_0 = arith.constant 0 : index
    %0 = vector.load %arg1[%c0, %c0_0] : memref<64x32xbf16, #tpu.memory_space<vmem>>, vector<64x32xbf16>
    %c0_1 = arith.constant 0 : index
    %c0_2 = arith.constant 0 : index
    %1 = vector.load %arg2[%c0_1, %c0_2] : memref<32x256xbf16, #tpu.memory_space<vmem>>, vector<32x256xbf16>
    %cst = arith.constant dense<0.000000e+00> : vector<64x256xf32>
    %2 = tpu.matmul %0, %1, %cst {dimension_numbers = #tpu.dot_dimension_numbers<[1], [0], [0], [1], [0, 0, 1, 1], [], []>} : vector<64x32xbf16>, vector<32x256xbf16>, vector<64x256xf32> -> vector<64x256xf32>
    %c0_3 = arith.constant 0 : index
    %c0_4 = arith.constant 0 : index
    %3 = vector.load %arg3[%c0_3, %c0_4] : memref<1x256xf32, #tpu.memory_space<vmem>>, vector<1x256xf32>
    %4 = vector.broadcast %3 : vector<1x256xf32> to vector<64x256xf32>
    %5 = arith.addf %2, %4 : vector<64x256xf32>
    %c0_5 = arith.constant 0 : index
    %c0_6 = arith.constant 0 : index
    %6 = vector.load %arg4[%c0_5, %c0_6] : memref<64x256xf32, #tpu.memory_space<vmem>>, vector<64x256xf32>
    tpu.vector_store %arg4[%c0_5, %c0_6], %5 {strides = array<i32>} : memref<64x256xf32, #tpu.memory_space<vmem>>, vector<64x256xf32>,
    return
  }
  func.func @transform_0(%arg0: i32) -> (i32, i32) {
    %c0_i32 = arith.constant 0 : i32
    %c0_i32_0 = arith.constant 0 : i32
    return %arg0, %c0_i32 : i32, i32
  }
  func.func @transform_1(%arg0: i32) -> (i32, i32) {
    %c0_i32 = arith.constant 0 : i32
    %c0_i32_0 = arith.constant 0 : i32
    %c0_i32_1 = arith.constant 0 : i32
    return %c0_i32, %c0_i32_0 : i32, i32
  }
  func.func @transform_2(%arg0: i32) -> (i32, i32) {
    %c0_i32 = arith.constant 0 : i32
    %c0_i32_0 = arith.constant 0 : i32
    %c0_i32_1 = arith.constant 0 : i32
    return %c0_i32, %c0_i32_0 : i32, i32
  }
  func.func @transform_3(%arg0: i32) -> (i32, i32) {
    %c0_i32 = arith.constant 0 : i32
    %c0_i32_0 = arith.constant 0 : i32
    return %arg0, %c0_i32 : i32, i32
  }
}

</mosaic_0001>

<bundles_post_ra>
// kernel: tpu_custom_call.1
= control target key start
LH: loop header
LB: loop body
LE: loop exit
PB: predicated region body
PF: predicated region fallthrough
CT: control target
= control target key end

     0   :  { %v252_v2 = vmov 0   ;;  %vm80_vm0 = vcmask 261120   ;;  %s315_s0 = inlined_call_operand.vmem [shape: bf16[64,32], index: 0, kind: input, shape index: {}]   ;;  %s316_s1 = inlined_call_operand.vmem [shape: bf16[32,256], index: 1, kind: input, shape index: {}]   ;;  %s317_s2 = inlined_call_operand.vmem [shape: f32[1,256], index: 2, kind: input, shape index: {}]   ;;  %s318_s3 = inlined_call_operand.hbm [shape: f32[64,256], index: 3, kind: output, shape index: {}]  }
   0x1   :  { %v218_v0 = vld [vmem:[%s316_s1 + $0x4] ss:$8 sps:$4 sm:$0xff]   ;;  %v220_v1 = vld [vmem:[%s316_s1] ss:$8 sps:$4 sm:$0xff]   ;;  %125 = vmatprep.mubr.bf16.mxu0 %v252_v2  ;;  %145 = vmatprep.mubr.bf16.mxu1 %v252_v2  ;;  %v221_v3 = vld [vmem:[%s316_s1 + $0x14] ss:$8 sps:$4 sm:$0xff]  }
   0x2   :  { %93 = vmatprep.subr.bf16.mxu0 %v218_v0  ;;  %210 = vmatprep.subr.bf16.mxu1 %v218_v0  ;;  %v223_v4 = vld [vmem:[%s316_s1 + $0x10] ss:$8 sps:$4 sm:$0xff]   ;;  %v224_v5 = vld [vmem:[%s315_s0] sm:$0xff]  }
   0x3   :  { %94 = vmatpush1.bf16.msra.mxu0 %v220_v1  ;;  %212 = vmatpush1.bf16.msra.mxu1 %v220_v1  ;;  %v225_v6 = vld [vmem:[%s315_s0 + $0x10] sm:$0xff]  }
   0x4   :  { %95 = vmatprep.subr.bf16.mxu0 %v221_v3  ;;  %211 = vmatprep.subr.bf16.mxu1 %v221_v3 }
   0x7   :  { %96 = vmatpush1.bf16.msra.mxu0 %v223_v4  ;;  %213 = vmatpush1.bf16.msra.mxu1 %v223_v4 }
   0x8   :  { %8 = vsyncpa [#allocation3], 0  ;;  %v226_v7 = vld [vmem:[%s315_s0 + $0x8] sm:$0xff]   ;;  %v227_v8 = vld [vmem:[%s315_s0 + $0x18] sm:$0xff]   ;;  %v30_v9 = vlaneseq  ;;  %s253_s0 = smov [#allocation2]  }
   0x9   :  { %v28_v12 = vld [vmem:[%s317_s2] sm:$0x3]  ;;  %s187_s2 = sshll.u32 %s253_s0, 4  ;;  %s188_s2 = int_to_ptr.vmem [resolvable:$true] %s187_s2 }
   0xa   :  { %206 = vmatmul.mubr.msk.bf16.vlgmr.msra.gmra.mrb[0].mxu0 %vm80_vm0, %v224_v5  ;;  %208 = vmatmul.mubr.msk.bf16.vlgmr.msra.gmra.mrb[0].mxu1 %vm80_vm0, %v225_v6  ;;  %v31_v10 = vshrl.u32 %v30_v9, 7  ;;  %s228_s29 = scalar_lea.vmem %s188_s2, 2048  ;;  %p233_p1 = scmp.lt.s32.totalorder %s188_s2, %s188_s2 }
   0xb   :  { %135 = vmatprep.mubr.bf16.mxu0 %v252_v2  ;;  %155 = vmatprep.mubr.bf16.mxu1 %v252_v2  ;;  %p229_p0 = scmp.ne.s32.totalorder %s188_s2, %s228_s29  ;;  %p234_p2 = scmp.lt.s32.totalorder %s228_s29, %s228_s29 }
   0xc   :  { %v32_v11 = vsub.s32 0, %v31_v10  ;;  %v36_v13 = vsub.s32 1, %v31_v10 }
   0xd   :  { %p235_p3 = por %p234_p2, %p233_p1 }
   0xe   :  { %v33_v14 = vrot.slane %v28_v12, %v32_v11  ;;  %v37_v15 = vrot.slane %v28_v12, %v36_v13 }
   0xf   :  { %p236_p4 = pnand %p235_p3, %p229_p0 }
  0x12   :  { %207 = vmatmul.mubr.msk.bf16.gmra.mrb[4].mxu0 %vm80_vm0, %v226_v7  ;;  %209 = vmatmul.mubr.msk.bf16.gmra.mrb[4].mxu1 %vm80_vm0, %v227_v8 }
  0xdd   :  { %v127_v16 = vpop.f32.mrb[0].mxu0  ;;  %v147_v17 = vpop.f32.mrb[0].mxu1 }
  0xde   :  { %v128_v18 = vadd.f32 %v127_v16, %v33_v14  ;;  %v148_v19 = vadd.f32 %v147_v17, %v33_v14  ;;  %v129_v20 = vpop.f32.mrb[1].mxu0  ;;  %v149_v21 = vpop.f32.mrb[1].mxu1 }
  0xdf   :  { %v130_v22 = vadd.f32 %v129_v20, %v37_v15  ;;  %v150_v23 = vadd.f32 %v149_v21, %v37_v15  ;;  %v131_v24 = vpop.f32.mrb[2].mxu0  ;;  %v151_v25 = vpop.f32.mrb[2].mxu1 }
  0xe0   :  { %166 = vst [vmem:[#allocation2] sm:$0xff] %v128_v18  ;;  %174 = vst [vmem:[#allocation2 + $0x40] sm:$0xff] %v148_v19  ;;  %v132_v26 = vadd.f32 %v131_v24, %v33_v14  ;;  %v152_v27 = vadd.f32 %v151_v25, %v33_v14  ;;  %v133_v28 = vpop.f32.mrb[3].mxu0  ;;  %v153_v29 = vpop.f32.mrb[3].mxu1 }
  0xe1   :  { %167 = vst [vmem:[#allocation2 + $0x8] sm:$0xff] %v130_v22  ;;  %175 = vst [vmem:[#allocation2 + $0x48] sm:$0xff] %v150_v23  ;;  %v134_v30 = vadd.f32 %v133_v28, %v37_v15  ;;  %v154_v31 = vadd.f32 %v153_v29, %v37_v15 }
  0xe2   :  { %168 = vst [vmem:[#allocation2 + $0x10] sm:$0xff] %v132_v26  ;;  %176 = vst [vmem:[#allocation2 + $0x50] sm:$0xff] %v152_v27 }
  0xe3   :  { %169 = vst [vmem:[#allocation2 + $0x18] sm:$0xff] %v134_v30  ;;  %177 = vst [vmem:[#allocation2 + $0x58] sm:$0xff] %v154_v31 }
  0xe5   :  { %v137_v32 = vpop.f32.mrb[4].mxu0  ;;  %v157_v33 = vpop.f32.mrb[4].mxu1 }
  0xe6   :  { %v138_v34 = vadd.f32 %v137_v32, %v33_v14  ;;  %v158_v35 = vadd.f32 %v157_v33, %v33_v14  ;;  %v139_v36 = vpop.f32.mrb[5].mxu0  ;;  %v159_v37 = vpop.f32.mrb[5].mxu1 }
  0xe7   :  { %v140_v38 = vadd.f32 %v139_v36, %v37_v15  ;;  %v160_v39 = vadd.f32 %v159_v37, %v37_v15  ;;  %v141_v40 = vpop.f32.mrb[6].mxu0  ;;  %v161_v41 = vpop.f32.mrb[6].mxu1 }
  0xe8   :  { %170 = vst [vmem:[#allocation2 + $0x20] sm:$0xff] %v138_v34  ;;  %178 = vst [vmem:[#allocation2 + $0x60] sm:$0xff] %v158_v35  ;;  %v142_v42 = vadd.f32 %v141_v40, %v33_v14  ;;  %v162_v43 = vadd.f32 %v161_v41, %v33_v14  ;;  %v143_v44 = vpop.f32.mrb[7].mxu0  ;;  %v163_v45 = vpop.f32.mrb[7].mxu1 }
  0xe9   :  { %171 = vst [vmem:[#allocation2 + $0x28] sm:$0xff] %v140_v38  ;;  %179 = vst [vmem:[#allocation2 + $0x68] sm:$0xff] %v160_v39  ;;  %v144_v46 = vadd.f32 %v143_v44, %v37_v15  ;;  %v164_v47 = vadd.f32 %v163_v45, %v37_v15 }
  0xea   :  { %172 = vst [vmem:[#allocation2 + $0x30] sm:$0xff] %v142_v42  ;;  %180 = vst [vmem:[#allocation2 + $0x70] sm:$0xff] %v162_v43 }
  0xeb   :  { %173 = vst [vmem:[#allocation2 + $0x38] sm:$0xff] %v144_v46  ;;  %181 = vst [vmem:[#allocation2 + $0x78] sm:$0xff] %v164_v47 }
  0xec   :  { %239 = shalt.err (!%p236_p4)
}
  0xed   :  { %s240_s5 = scalar_lea.hbm %s318_s3, 2048 }
  0xee   :  { %p241_p5 = scmp.ne.s32.totalorder %s318_s3, %s240_s5  ;;  %p244_p6 = scmp.lt.u32.totalorder %s240_s5, %s318_s3 }
  0xf0   :  { %p246_p7 = pnand %p244_p6, %p241_p5 }
  0xf2   :  { %249 = shalt.err (!%p246_p7)
}
  0xf3   :  { %s254_s10 = smov 256   ;;  %s255_s11 = smov 16  }
  0xf4   :  { %193 = dma.vmem_to_hbm [thread:$0]  %s188_s2, 2048, %s318_s3, [#allocation3], %s254_s10, %s254_s10, %s255_s11  }
  0xf5   :  { %250 = dma.done.wait [#allocation3], 2048  }
  0xf6   :  { %251 = vsyncadd [#allocation3], 4294965248 }
  0xf7   :  { %197 = vsyncpa [#allocation3], 1 }

</bundles_post_ra>
